<compile_context>
chip_gen: v6e
topology: v6e:2x2x1
jax: 0.10.0
libtpu: 0.0.40
codegen_flags: <defaults>
</compile_context>

<pallas_src>
import jax
import jax.numpy as jnp
from jax.experimental import pallas as pl
from jax.experimental.pallas import tpu as pltpu

ITERATION = 20


def _crf_kernel(feats_ref, logits_ref, w_ref, out_ref):
    feats = feats_ref[...].astype(jnp.float32)     # (TB, N, E)
    unary = logits_ref[...].astype(jnp.float32)    # (TB, 1, N)  lane-dense state
    w_sym = w_ref[...].astype(jnp.float32)         # (N, N)      pre-symmetrized

    # --- cosine-similarity pairwise potential -------------------------------
    # inv_norm on the EUP (rsqrt), then a cheap N*E scale instead of an N^2 divide.
    inv_norm = jax.lax.rsqrt(jnp.sum(feats * feats, axis=2, keepdims=True))   # (TB, N, 1)
    feats_n = feats * inv_norm                                                # (TB, N, E)
    # Batched feats_n @ feats_n^T; contraction on E (last dims) folds the
    # transpose into the MXU operand fetch (same pattern as 'bqd,bkd->bqk').
    pairwise_sim = jax.lax.dot_general(
        feats_n, feats_n,
        dimension_numbers=(((2,), (2,)), ((0,), (0,))),
        preferred_element_type=jnp.float32)                                   # (TB, N, N)
    pot = pairwise_sim * w_sym[None, :, :]                                    # (TB, N, N)

    # --- mean-field iterations ----------------------------------------------
    #   E[b, 0, i] = sum_j pot[b, i, j] * tanh(logits[b, 0, j] / 2)
    # (tanh(x/2) == 2*sigmoid(x) - 1, exactly.)
    def body(_, logits):
        t = jnp.tanh(0.5 * logits)                                            # (TB, 1, N)
        e = jax.lax.dot_general(
            t, pot,
            dimension_numbers=(((2,), (2,)), ((0,), (0,))),
            preferred_element_type=jnp.float32)                               # (TB, 1, N)
        return unary + e

    logits = jax.lax.fori_loop(0, ITERATION, body, unary, unroll=True)
    out_ref[...] = logits.astype(out_ref.dtype)


def _pick_block_b(B, N, E, budget_bytes=8 * 1024 * 1024):
    """Largest divisor of B whose rough f32 VMEM footprint stays under budget."""
    per_item = 4 * (2 * N * E + 2 * N * N + 4 * N)   # feats, feats_n, sim, pot, vectors
    tb = max(1, min(B, budget_bytes // max(per_item, 1)))
    while B % tb:
        tb -= 1
    return tb


def crf_forward(feats, logits, W):
    """feats [B,N,E], logits [B,N,1], W [1,N,N] -> [B,N,1]"""
    B, N, E = feats.shape

    # Batch-invariant work hoisted out of the kernel: symmetrize W once.
    w_sym = ((W + jnp.swapaxes(W, 1, 2)) * 0.5)[0]          # (N, N)
    # Lane-dense state: carry the per-node logits along the lane axis.
    logits_row = jnp.swapaxes(logits, 1, 2)                 # (B, 1, N)

    tb = _pick_block_b(B, N, E)
    grid = (B // tb,)

    # Note: for very large N, additionally single-buffer the (constant) w_sym
    # operand and/or cast pot to bf16 + raise vmem_limit_bytes; unnecessary here.
    out = pl.pallas_call(
        _crf_kernel,
        out_shape=jax.ShapeDtypeStruct((B, 1, N), logits.dtype),
        grid_spec=pltpu.PrefetchScalarGridSpec(
            num_scalar_prefetch=0,
            grid=grid,
            in_specs=[
                pl.BlockSpec((tb, N, E), lambda b: (b, 0, 0)),
                pl.BlockSpec((tb, 1, N), lambda b: (b, 0, 0)),
                pl.BlockSpec((N, N), lambda b: (0, 0)),
            ],
            out_specs=pl.BlockSpec((tb, 1, N), lambda b: (b, 0, 0)),
        ),
        compiler_params=pltpu.CompilerParams(
            dimension_semantics=("parallel",)),
    )(feats, logits_row, w_sym)

    return jnp.swapaxes(out, 1, 2)                          # (B, N, 1)


def crf_reference(feats, logits, W):
    """Pure-JAX reference mirroring the PyTorch forward."""
    norm = jnp.linalg.norm(feats, axis=2, keepdims=True)                 # (B,N,1)
    pairwise_norm = jnp.einsum('bni,bmi->bnm', norm, norm)               # (B,N,N)
    pairwise_dot = jnp.einsum('bne,bme->bnm', feats, feats)              # (B,N,N)
    pairwise_sim = pairwise_dot / pairwise_norm
    w_sym = (W + jnp.transpose(W, (0, 2, 1))) / 2.0
    pot = pairwise_sim * w_sym
    unary = logits
    out = logits
    for _ in range(ITERATION):
        probs = jnp.transpose(jax.nn.sigmoid(out), (0, 2, 1))            # (B,1,N)
        e = jnp.sum(probs * pot - (1.0 - probs) * pot, axis=2, keepdims=True)
        out = unary + e
    return out


if __name__ == "__main__":
    B, N, E = 2, 16, 32

    key = jax.random.PRNGKey(0)
    k1, k2, k3 = jax.random.split(key, 3)
    feats = jax.random.normal(k1, (B, N, E), dtype=jnp.float32)
    logits = jax.random.normal(k2, (B, N, 1), dtype=jnp.float32)
    # Module __init__ uses zeros for W; use small deterministic values so the
    # mean-field update actually exercises the compute path.
    W = 0.1 * jax.random.normal(k3, (1, N, N), dtype=jnp.float32)

    out = crf_forward(feats, logits, W)
    out = jax.block_until_ready(out)

    ref = crf_reference(feats, logits, W)
    assert out.shape == (B, N, 1)
    assert jnp.allclose(out, ref, atol=1e-4, rtol=1e-4), \
        f"max abs err {jnp.max(jnp.abs(out - ref))}"

    print("KERNEL_OK")
</pallas_src>

<mosaic_0001>
module attributes {stable_mosaic.version = 11 : i64} {
  func.func @_crf_kernel(%arg0: i32, %arg1: memref<2x16x32xf32, #tpu.memory_space<vmem>>, %arg2: memref<2x1x16xf32, #tpu.memory_space<vmem>>, %arg3: memref<16x16xf32, #tpu.memory_space<vmem>>, %arg4: memref<2x1x16xf32, #tpu.memory_space<vmem>>) attributes {dimension_semantics = [#tpu.dimension_semantics<parallel>], iteration_bounds = array<i64: 1>, scalar_prefetch = 0 : i64, scratch_operands = 0 : i64, tpu.core_type = #tpu.core_type<tc>, window_params = [{transform_indices = @transform_0, window_bounds = array<i64: 2, 16, 32>}, {transform_indices = @transform_1, window_bounds = array<i64: 2, 1, 16>}, {pipeline_mode = #tpu.pipeline_mode<synchronous>, transform_indices = @transform_2, window_bounds = array<i64: 16, 16>}, {transform_indices = @transform_3, window_bounds = array<i64: 2, 1, 16>}]} {
    %c0 = arith.constant 0 : index
    %c0_0 = arith.constant 0 : index
    %c0_1 = arith.constant 0 : index
    %0 = vector.load %arg1[%c0, %c0_0, %c0_1] : memref<2x16x32xf32, #tpu.memory_space<vmem>>, vector<2x16x32xf32>
    %c0_2 = arith.constant 0 : index
    %c0_3 = arith.constant 0 : index
    %c0_4 = arith.constant 0 : index
    %1 = vector.load %arg2[%c0_2, %c0_3, %c0_4] : memref<2x1x16xf32, #tpu.memory_space<vmem>>, vector<2x1x16xf32>
    %c0_5 = arith.constant 0 : index
    %c0_6 = arith.constant 0 : index
    %2 = vector.load %arg3[%c0_5, %c0_6] : memref<16x16xf32, #tpu.memory_space<vmem>>, vector<16x16xf32>
    %3 = arith.mulf %0, %0 : vector<2x16x32xf32>
    %cst = arith.constant dense<0.000000e+00> : vector<2x16xf32>
    %4 = vector.multi_reduction <add>, %3, %cst [2] : vector<2x16x32xf32> to vector<2x16xf32>
    %5 = vector.shape_cast %4 : vector<2x16xf32> to vector<2x16x1xf32>
    %6 = math.rsqrt %5 : vector<2x16x1xf32>
    %7 = vector.broadcast %6 : vector<2x16x1xf32> to vector<2x16x32xf32>
    %8 = arith.mulf %0, %7 : vector<2x16x32xf32>
    %cst_7 = arith.constant dense<0.000000e+00> : vector<2x16x16xf32>
    %9 = tpu.matmul %8, %8, %cst_7 {dimension_numbers = #tpu.dot_dimension_numbers<[2], [2], [1], [1], [0, 0, 0, 1, 1, 1], [0], [0]>} : vector<2x16x32xf32>, vector<2x16x32xf32>, vector<2x16x16xf32> -> vector<2x16x16xf32>
    %10 = vector.shape_cast %2 : vector<16x16xf32> to vector<1x16x16xf32>
    %11 = vector.broadcast %10 : vector<1x16x16xf32> to vector<2x16x16xf32>
    %12 = arith.mulf %9, %11 : vector<2x16x16xf32>
    %c0_i32 = arith.constant 0 : i32
    %cst_8 = arith.constant 5.000000e-01 : f32
    %13 = vector.broadcast %cst_8 : f32 to vector<2x1x16xf32>
    %14 = arith.mulf %13, %1 : vector<2x1x16xf32>
    %15 = math.tanh %14 : vector<2x1x16xf32>
    %cst_9 = arith.constant dense<0.000000e+00> : vector<2x1x16xf32>
    %16 = tpu.matmul %15, %12, %cst_9 {dimension_numbers = #tpu.dot_dimension_numbers<[2], [2], [1], [1], [0, 0, 0, 1, 1, 1], [0], [0]>} : vector<2x1x16xf32>, vector<2x16x16xf32>, vector<2x1x16xf32> -> vector<2x1x16xf32>
    %17 = arith.addf %1, %16 : vector<2x1x16xf32>
    %c1_i32 = arith.constant 1 : i32
    %cst_10 = arith.constant 5.000000e-01 : f32
    %18 = vector.broadcast %cst_10 : f32 to vector<2x1x16xf32>
    %19 = arith.mulf %18, %17 : vector<2x1x16xf32>
    %20 = math.tanh %19 : vector<2x1x16xf32>
    %cst_11 = arith.constant dense<0.000000e+00> : vector<2x1x16xf32>
    %21 = tpu.matmul %20, %12, %cst_11 {dimension_numbers = #tpu.dot_dimension_numbers<[2], [2], [1], [1], [0, 0, 0, 1, 1, 1], [0], [0]>} : vector<2x1x16xf32>, vector<2x16x16xf32>, vector<2x1x16xf32> -> vector<2x1x16xf32>
    %22 = arith.addf %1, %21 : vector<2x1x16xf32>
    %c2_i32 = arith.constant 2 : i32
    %cst_12 = arith.constant 5.000000e-01 : f32
    %23 = vector.broadcast %cst_12 : f32 to vector<2x1x16xf32>
    %24 = arith.mulf %23, %22 : vector<2x1x16xf32>
    %25 = math.tanh %24 : vector<2x1x16xf32>
    %cst_13 = arith.constant dense<0.000000e+00> : vector<2x1x16xf32>
    %26 = tpu.matmul %25, %12, %cst_13 {dimension_numbers = #tpu.dot_dimension_numbers<[2], [2], [1], [1], [0, 0, 0, 1, 1, 1], [0], [0]>} : vector<2x1x16xf32>, vector<2x16x16xf32>, vector<2x1x16xf32> -> vector<2x1x16xf32>
    %27 = arith.addf %1, %26 : vector<2x1x16xf32>
    %c3_i32 = arith.constant 3 : i32
    %cst_14 = arith.constant 5.000000e-01 : f32
    %28 = vector.broadcast %cst_14 : f32 to vector<2x1x16xf32>
    %29 = arith.mulf %28, %27 : vector<2x1x16xf32>
    %30 = math.tanh %29 : vector<2x1x16xf32>
    %cst_15 = arith.constant dense<0.000000e+00> : vector<2x1x16xf32>
    %31 = tpu.matmul %30, %12, %cst_15 {dimension_numbers = #tpu.dot_dimension_numbers<[2], [2], [1], [1], [0, 0, 0, 1, 1, 1], [0], [0]>} : vector<2x1x16xf32>, vector<2x16x16xf32>, vector<2x1x16xf32> -> vector<2x1x16xf32>
    %32 = arith.addf %1, %31 : vector<2x1x16xf32>
    %c4_i32 = arith.constant 4 : i32
    %cst_16 = arith.constant 5.000000e-01 : f32
    %33 = vector.broadcast %cst_16 : f32 to vector<2x1x16xf32>
    %34 = arith.mulf %33, %32 : vector<2x1x16xf32>
    %35 = math.tanh %34 : vector<2x1x16xf32>
    %cst_17 = arith.constant dense<0.000000e+00> : vector<2x1x16xf32>
    %36 = tpu.matmul %35, %12, %cst_17 {dimension_numbers = #tpu.dot_dimension_numbers<[2], [2], [1], [1], [0, 0, 0, 1, 1, 1], [0], [0]>} : vector<2x1x16xf32>, vector<2x16x16xf32>, vector<2x1x16xf32> -> vector<2x1x16xf32>
    %37 = arith.addf %1, %36 : vector<2x1x16xf32>
    %c5_i32 = arith.constant 5 : i32
    %cst_18 = arith.constant 5.000000e-01 : f32
    %38 = vector.broadcast %cst_18 : f32 to vector<2x1x16xf32>
    %39 = arith.mulf %38, %37 : vector<2x1x16xf32>
    %40 = math.tanh %39 : vector<2x1x16xf32>
    %cst_19 = arith.constant dense<0.000000e+00> : vector<2x1x16xf32>
    %41 = tpu.matmul %40, %12, %cst_19 {dimension_numbers = #tpu.dot_dimension_numbers<[2], [2], [1], [1], [0, 0, 0, 1, 1, 1], [0], [0]>} : vector<2x1x16xf32>, vector<2x16x16xf32>, vector<2x1x16xf32> -> vector<2x1x16xf32>
    %42 = arith.addf %1, %41 : vector<2x1x16xf32>
    %c6_i32 = arith.constant 6 : i32
    %cst_20 = arith.constant 5.000000e-01 : f32
    %43 = vector.broadcast %cst_20 : f32 to vector<2x1x16xf32>
    %44 = arith.mulf %43, %42 : vector<2x1x16xf32>
    %45 = math.tanh %44 : vector<2x1x16xf32>
    %cst_21 = arith.constant dense<0.000000e+00> : vector<2x1x16xf32>
    %46 = tpu.matmul %45, %12, %cst_21 {dimension_numbers = #tpu.dot_dimension_numbers<[2], [2], [1], [1], [0, 0, 0, 1, 1, 1], [0], [0]>} : vector<2x1x16xf32>, vector<2x16x16xf32>, vector<2x1x16xf32> -> vector<2x1x16xf32>
    %47 = arith.addf %1, %46 : vector<2x1x16xf32>
    %c7_i32 = arith.constant 7 : i32
    %cst_22 = arith.constant 5.000000e-01 : f32
    %48 = vector.broadcast %cst_22 : f32 to vector<2x1x16xf32>
    %49 = arith.mulf %48, %47 : vector<2x1x16xf32>
    %50 = math.tanh %49 : vector<2x1x16xf32>
    %cst_23 = arith.constant dense<0.000000e+00> : vector<2x1x16xf32>
    %51 = tpu.matmul %50, %12, %cst_23 {dimension_numbers = #tpu.dot_dimension_numbers<[2], [2], [1], [1], [0, 0, 0, 1, 1, 1], [0], [0]>} : vector<2x1x16xf32>, vector<2x16x16xf32>, vector<2x1x16xf32> -> vector<2x1x16xf32>
    %52 = arith.addf %1, %51 : vector<2x1x16xf32>
    %c8_i32 = arith.constant 8 : i32
    %cst_24 = arith.constant 5.000000e-01 : f32
    %53 = vector.broadcast %cst_24 : f32 to vector<2x1x16xf32>
    %54 = arith.mulf %53, %52 : vector<2x1x16xf32>
    %55 = math.tanh %54 : vector<2x1x16xf32>
    %cst_25 = arith.constant dense<0.000000e+00> : vector<2x1x16xf32>
    %56 = tpu.matmul %55, %12, %cst_25 {dimension_numbers = #tpu.dot_dimension_numbers<[2], [2], [1], [1], [0, 0, 0, 1, 1, 1], [0], [0]>} : vector<2x1x16xf32>, vector<2x16x16xf32>, vector<2x1x16xf32> -> vector<2x1x16xf32>
    %57 = arith.addf %1, %56 : vector<2x1x16xf32>
    %c9_i32 = arith.constant 9 : i32
    %cst_26 = arith.constant 5.000000e-01 : f32
    %58 = vector.broadcast %cst_26 : f32 to vector<2x1x16xf32>
    %59 = arith.mulf %58, %57 : vector<2x1x16xf32>
    %60 = math.tanh %59 : vector<2x1x16xf32>
    %cst_27 = arith.constant dense<0.000000e+00> : vector<2x1x16xf32>
    %61 = tpu.matmul %60, %12, %cst_27 {dimension_numbers = #tpu.dot_dimension_numbers<[2], [2], [1], [1], [0, 0, 0, 1, 1, 1], [0], [0]>} : vector<2x1x16xf32>, vector<2x16x16xf32>, vector<2x1x16xf32> -> vector<2x1x16xf32>
    %62 = arith.addf %1, %61 : vector<2x1x16xf32>
    %c10_i32 = arith.constant 10 : i32
    %cst_28 = arith.constant 5.000000e-01 : f32
    %63 = vector.broadcast %cst_28 : f32 to vector<2x1x16xf32>
    %64 = arith.mulf %63, %62 : vector<2x1x16xf32>
    %65 = math.tanh %64 : vector<2x1x16xf32>
    %cst_29 = arith.constant dense<0.000000e+00> : vector<2x1x16xf32>
    %66 = tpu.matmul %65, %12, %cst_29 {dimension_numbers = #tpu.dot_dimension_numbers<[2], [2], [1], [1], [0, 0, 0, 1, 1, 1], [0], [0]>} : vector<2x1x16xf32>, vector<2x16x16xf32>, vector<2x1x16xf32> -> vector<2x1x16xf32>
    %67 = arith.addf %1, %66 : vector<2x1x16xf32>
    %c11_i32 = arith.constant 11 : i32
    %cst_30 = arith.constant 5.000000e-01 : f32
    %68 = vector.broadcast %cst_30 : f32 to vector<2x1x16xf32>
    %69 = arith.mulf %68, %67 : vector<2x1x16xf32>
    %70 = math.tanh %69 : vector<2x1x16xf32>
    %cst_31 = arith.constant dense<0.000000e+00> : vector<2x1x16xf32>
    %71 = tpu.matmul %70, %12, %cst_31 {dimension_numbers = #tpu.dot_dimension_numbers<[2], [2], [1], [1], [0, 0, 0, 1, 1, 1], [0], [0]>} : vector<2x1x16xf32>, vector<2x16x16xf32>, vector<2x1x16xf32> -> vector<2x1x16xf32>
    %72 = arith.addf %1, %71 : vector<2x1x16xf32>
    %c12_i32 = arith.constant 12 : i32
    %cst_32 = arith.constant 5.000000e-01 : f32
    %73 = vector.broadcast %cst_32 : f32 to vector<2x1x16xf32>
    %74 = arith.mulf %73, %72 : vector<2x1x16xf32>
    %75 = math.tanh %74 : vector<2x1x16xf32>
    %cst_33 = arith.constant dense<0.000000e+00> : vector<2x1x16xf32>
    %76 = tpu.matmul %75, %12, %cst_33 {dimension_numbers = #tpu.dot_dimension_numbers<[2], [2], [1], [1], [0, 0, 0, 1, 1, 1], [0], [0]>} : vector<2x1x16xf32>, vector<2x16x16xf32>, vector<2x1x16xf32> -> vector<2x1x16xf32>
    %77 = arith.addf %1, %76 : vector<2x1x16xf32>
    %c13_i32 = arith.constant 13 : i32
    %cst_34 = arith.constant 5.000000e-01 : f32
    %78 = vector.broadcast %cst_34 : f32 to vector<2x1x16xf32>
    %79 = arith.mulf %78, %77 : vector<2x1x16xf32>
    %80 = math.tanh %79 : vector<2x1x16xf32>
    %cst_35 = arith.constant dense<0.000000e+00> : vector<2x1x16xf32>
    %81 = tpu.matmul %80, %12, %cst_35 {dimension_numbers = #tpu.dot_dimension_numbers<[2], [2], [1], [1], [0, 0, 0, 1, 1, 1], [0], [0]>} : vector<2x1x16xf32>, vector<2x16x16xf32>, vector<2x1x16xf32> -> vector<2x1x16xf32>
    %82 = arith.addf %1, %81 : vector<2x1x16xf32>
    %c14_i32 = arith.constant 14 : i32
    %cst_36 = arith.constant 5.000000e-01 : f32
    %83 = vector.broadcast %cst_36 : f32 to vector<2x1x16xf32>
    %84 = arith.mulf %83, %82 : vector<2x1x16xf32>
    %85 = math.tanh %84 : vector<2x1x16xf32>
    %cst_37 = arith.constant dense<0.000000e+00> : vector<2x1x16xf32>
    %86 = tpu.matmul %85, %12, %cst_37 {dimension_numbers = #tpu.dot_dimension_numbers<[2], [2], [1], [1], [0, 0, 0, 1, 1, 1], [0], [0]>} : vector<2x1x16xf32>, vector<2x16x16xf32>, vector<2x1x16xf32> -> vector<2x1x16xf32>
    %87 = arith.addf %1, %86 : vector<2x1x16xf32>
    %c15_i32 = arith.constant 15 : i32
    %cst_38 = arith.constant 5.000000e-01 : f32
    %88 = vector.broadcast %cst_38 : f32 to vector<2x1x16xf32>
    %89 = arith.mulf %88, %87 : vector<2x1x16xf32>
    %90 = math.tanh %89 : vector<2x1x16xf32>
    %cst_39 = arith.constant dense<0.000000e+00> : vector<2x1x16xf32>
    %91 = tpu.matmul %90, %12, %cst_39 {dimension_numbers = #tpu.dot_dimension_numbers<[2], [2], [1], [1], [0, 0, 0, 1, 1, 1], [0], [0]>} : vector<2x1x16xf32>, vector<2x16x16xf32>, vector<2x1x16xf32> -> vector<2x1x16xf32>
    %92 = arith.addf %1, %91 : vector<2x1x16xf32>
    %c16_i32 = arith.constant 16 : i32
    %cst_40 = arith.constant 5.000000e-01 : f32
    %93 = vector.broadcast %cst_40 : f32 to vector<2x1x16xf32>
    %94 = arith.mulf %93, %92 : vector<2x1x16xf32>
    %95 = math.tanh %94 : vector<2x1x16xf32>
    %cst_41 = arith.constant dense<0.000000e+00> : vector<2x1x16xf32>
    %96 = tpu.matmul %95, %12, %cst_41 {dimension_numbers = #tpu.dot_dimension_numbers<[2], [2], [1], [1], [0, 0, 0, 1, 1, 1], [0], [0]>} : vector<2x1x16xf32>, vector<2x16x16xf32>, vector<2x1x16xf32> -> vector<2x1x16xf32>
    %97 = arith.addf %1, %96 : vector<2x1x16xf32>
    %c17_i32 = arith.constant 17 : i32
    %cst_42 = arith.constant 5.000000e-01 : f32
    %98 = vector.broadcast %cst_42 : f32 to vector<2x1x16xf32>
    %99 = arith.mulf %98, %97 : vector<2x1x16xf32>
    %100 = math.tanh %99 : vector<2x1x16xf32>
    %cst_43 = arith.constant dense<0.000000e+00> : vector<2x1x16xf32>
    %101 = tpu.matmul %100, %12, %cst_43 {dimension_numbers = #tpu.dot_dimension_numbers<[2], [2], [1], [1], [0, 0, 0, 1, 1, 1], [0], [0]>} : vector<2x1x16xf32>, vector<2x16x16xf32>, vector<2x1x16xf32> -> vector<2x1x16xf32>
    %102 = arith.addf %1, %101 : vector<2x1x16xf32>
    %c18_i32 = arith.constant 18 : i32
    %cst_44 = arith.constant 5.000000e-01 : f32
    %103 = vector.broadcast %cst_44 : f32 to vector<2x1x16xf32>
    %104 = arith.mulf %103, %102 : vector<2x1x16xf32>
    %105 = math.tanh %104 : vector<2x1x16xf32>
    %cst_45 = arith.constant dense<0.000000e+00> : vector<2x1x16xf32>
    %106 = tpu.matmul %105, %12, %cst_45 {dimension_numbers = #tpu.dot_dimension_numbers<[2], [2], [1], [1], [0, 0, 0, 1, 1, 1], [0], [0]>} : vector<2x1x16xf32>, vector<2x16x16xf32>, vector<2x1x16xf32> -> vector<2x1x16xf32>
    %107 = arith.addf %1, %106 : vector<2x1x16xf32>
    %c19_i32 = arith.constant 19 : i32
    %cst_46 = arith.constant 5.000000e-01 : f32
    %108 = vector.broadcast %cst_46 : f32 to vector<2x1x16xf32>
    %109 = arith.mulf %108, %107 : vector<2x1x16xf32>
    %110 = math.tanh %109 : vector<2x1x16xf32>
    %cst_47 = arith.constant dense<0.000000e+00> : vector<2x1x16xf32>
    %111 = tpu.matmul %110, %12, %cst_47 {dimension_numbers = #tpu.dot_dimension_numbers<[2], [2], [1], [1], [0, 0, 0, 1, 1, 1], [0], [0]>} : vector<2x1x16xf32>, vector<2x16x16xf32>, vector<2x1x16xf32> -> vector<2x1x16xf32>
    %112 = arith.addf %1, %111 : vector<2x1x16xf32>
    %c0_48 = arith.constant 0 : index
    %c0_49 = arith.constant 0 : index
    %c0_50 = arith.constant 0 : index
    %113 = vector.load %arg4[%c0_48, %c0_49, %c0_50] : memref<2x1x16xf32, #tpu.memory_space<vmem>>, vector<2x1x16xf32>
    tpu.vector_store %arg4[%c0_48, %c0_49, %c0_50], %112 {strides = array<i32>} : memref<2x1x16xf32, #tpu.memory_space<vmem>>, vector<2x1x16xf32>,
    return
  }
  func.func @transform_0(%arg0: i32) -> (i32, i32, i32) {
    %c0_i32 = arith.constant 0 : i32
    %c0_i32_0 = arith.constant 0 : i32
    %c0_i32_1 = arith.constant 0 : i32
    return %arg0, %c0_i32, %c0_i32_0 : i32, i32, i32
  }
  func.func @transform_1(%arg0: i32) -> (i32, i32, i32) {
    %c0_i32 = arith.constant 0 : i32
    %c0_i32_0 = arith.constant 0 : i32
    %c0_i32_1 = arith.constant 0 : i32
    return %arg0, %c0_i32, %c0_i32_0 : i32, i32, i32
  }
  func.func @transform_2(%arg0: i32) -> (i32, i32) {
    %c0_i32 = arith.constant 0 : i32
    %c0_i32_0 = arith.constant 0 : i32
    %c0_i32_1 = arith.constant 0 : i32
    return %c0_i32, %c0_i32_0 : i32, i32
  }
  func.func @transform_3(%arg0: i32) -> (i32, i32, i32) {
    %c0_i32 = arith.constant 0 : i32
    %c0_i32_0 = arith.constant 0 : i32
    %c0_i32_1 = arith.constant 0 : i32
    return %arg0, %c0_i32, %c0_i32_0 : i32, i32, i32
  }
}

</mosaic_0001>

<bundles_post_ra>
// kernel: tpu_custom_call.1
= control target key start
LH: loop header
LB: loop body
LE: loop exit
PB: predicated region body
PF: predicated region fallthrough
CT: control target
= control target key end

     0   :  { %8 = vsyncpa [#allocation3], 0  ;;  %s4541_s0 = inlined_call_operand.hbm [shape: f32[2,16,32], index: 0, kind: input, shape index: {}]   ;;  %s4542_s1 = inlined_call_operand.hbm [shape: f32[2,1,16], index: 1, kind: input, shape index: {}]   ;;  %s4543_s2 = inlined_call_operand.hbm [shape: f32[16,16], index: 2, kind: input, shape index: {}]   ;;  %s4544_s3 = inlined_call_operand.hbm [shape: f32[2,1,16], index: 3, kind: output, shape index: {}]  }
   0x1   :  { %9 = vsyncpa [#allocation6], 0 }
   0x2   :  { %10 = vsyncpa [#allocation4], 0  ;;  %s4063_s12 = smov [#allocation5]  }
   0x3   :  { %s28_s13 = sshll.u32 %s4063_s12, 4  ;;  %s29_s13 = int_to_ptr.vmem [resolvable:$true] %s28_s13 }
   0x4   :  { %s3985_s14 = scalar_lea.vmem %s29_s13, 32  ;;  %p3990_p1 = scmp.lt.s32.totalorder %s29_s13, %s29_s13 }
   0x5   :  { %p3986_p0 = scmp.ne.s32.totalorder %s29_s13, %s3985_s14  ;;  %p3991_p2 = scmp.lt.s32.totalorder %s3985_s14, %s3985_s14 }
   0x7   :  { %p3992_p3 = por %p3991_p2, %p3990_p1 }
   0x9   :  { %p3993_p4 = pnand %p3992_p3, %p3986_p0 }
   0xb   :  { %3996 = shalt.err (!%p3993_p4)
}
   0xc   :  { %s4064_s15 = smov 16   ;;  %s4065_s16 = smov 1  }
   0xd   :  { %34 = dma.hbm_to_vmem [thread:$0]  %s4542_s1, 32, %s29_s13, [#allocation6], %s4064_s15, %s4064_s15, %s4065_s16  }
   0xe   :  { %s4066_s19 = smov [#allocation2]  }
   0xf   :  { %s16_s20 = sshll.u32 %s4066_s19, 4  ;;  %s17_s20 = int_to_ptr.vmem [resolvable:$true] %s16_s20 }
  0x10   :  { %s4005_s21 = scalar_lea.vmem %s17_s20, 512  ;;  %p4010_p6 = scmp.lt.s32.totalorder %s17_s20, %s17_s20 }
  0x11   :  { %p4006_p5 = scmp.ne.s32.totalorder %s17_s20, %s4005_s21  ;;  %p4011_p7 = scmp.lt.s32.totalorder %s4005_s21, %s4005_s21 }
  0x13   :  { %p4012_p8 = por %p4011_p7, %p4010_p6 }
  0x15   :  { %p4013_p9 = pnand %p4012_p8, %p4006_p5 }
  0x17   :  { %4016 = shalt.err (!%p4013_p9)
}
  0x18   :  { %s4067_s22 = smov 128   ;;  %s4068_s23 = smov 8  }
  0x19   :  { %22 = dma.hbm_to_vmem [thread:$0]  %s4541_s0, 512, %s17_s20, [#allocation3], %s4067_s22, %s4067_s22, %s4068_s23  }
  0x1a   :  { %s4069_s26 = smov [#allocation7]  }
  0x1b   :  { %s40_s27 = sshll.u32 %s4069_s26, 4  ;;  %s41_s27 = int_to_ptr.vmem [resolvable:$true] %s40_s27 }
  0x1c   :  { %s4025_s1 = scalar_lea.vmem %s41_s27, 256  ;;  %p4030_p11 = scmp.lt.s32.totalorder %s41_s27, %s41_s27 }
  0x1d   :  { %p4026_p10 = scmp.ne.s32.totalorder %s41_s27, %s4025_s1  ;;  %p4031_p12 = scmp.lt.s32.totalorder %s4025_s1, %s4025_s1 }
  0x1f   :  { %p4032_p13 = por %p4031_p12, %p4030_p11 }
  0x21   :  { %p4033_p0 = pnand %p4032_p13, %p4026_p10 }
  0x23   :  { %4036 = shalt.err (!%p4033_p0)
}
  0x24   :  { %46 = dma.hbm_to_vmem [thread:$0]  %s4543_s2, 256, %s41_s27, [#allocation6], %s4067_s22, %s4067_s22, %s4068_s23  }
  0x25   :  { %4057 = dma.done.wait [#allocation3], 512  }
  0x26   :  { %4058 = vsyncadd [#allocation3], 4294966784 }
  0x27   :  { %4059 = dma.done.wait [#allocation6], 288  }
  0x28   :  { %4060 = vsyncadd [#allocation6], 4294967008  ;;  %v57_v0 = vld [vmem:[#allocation2 + $0x8] sm:$0xff]  ;;  %vm68_vm0 = vcmask 261120   ;;  %v59_v1 = vld [vmem:[#allocation2 + $0x18] sm:$0xff]  ;;  %v4070_v24 = vmov 0.0  }
  0x29   :  { %v56_v2 = vld [vmem:[#allocation2] sm:$0xff]  ;;  %v65_v3 = vmul.f32 %v57_v0, %v57_v0  ;;  %v67_v4 = vmul.f32 %v59_v1, %v59_v1  ;;  %v58_v6 = vld [vmem:[#allocation2 + $0x10] sm:$0xff]  ;;  %vm4071_vm1 = vmmov 0   ;;  %vm259_vm2 = vcmask 130048   ;;  %s4072_s0 = smov [#allocation8]  }
  0x2a   :  { %v64_v5 = vmul.f32 %v56_v2, %v56_v2  ;;  %v66_v7 = vmul.f32 %v58_v6, %v58_v6  ;;  %v4127_v25 = vld [vmem:[#allocation5] sm:$0x1]  ;;  %v4130_v27 = vld [vmem:[#allocation5 + $0x1] sm:$0x1]  ;;  %v63_v29 = vld [vmem:[#allocation7 + $0x8] sm:$0xff]  ;;  %vm3308_vm3 = vcmask 122880  }
  0x2b   :  { %v72_v8 = vsel %vm68_vm0, %v65_v3, 0.0  ;;  %v78_v10 = vsel %vm68_vm0, %v67_v4, 0.0  ;;  %v255_v26 = vmul.f32 0.5, %v4127_v25  ;;  %v256_v28 = vmul.f32 0.5, %v4130_v27  ;;  %v62_v32 = vld [vmem:[#allocation7] sm:$0xff]  ;;  %s3316_s2 = sshll.u32 %s4072_s0, 4  ;;  %s3317_s2 = int_to_ptr.vmem [resolvable:$true] %s3316_s2 }
  0x2c   :  { %v69_v9 = vsel %vm68_vm0, %v64_v5, 0.0  ;;  %73 = vadd.xlane.f32.xlu0 %v72_v8  ;;  %v75_v11 = vsel %vm68_vm0, %v66_v7, 0.0  ;;  %s4037_s30 = scalar_lea.vmem %s3317_s2, 32  ;;  %p4042_p2 = scmp.lt.s32.totalorder %s3317_s2, %s3317_s2 }
  0x2d   :  { %70 = vadd.xlane.f32.xlu1 %v69_v9  ;;  %p4038_p1 = scmp.ne.s32.totalorder %s3317_s2, %s4037_s30  ;;  %p4043_p3 = scmp.lt.s32.totalorder %s4037_s30, %s4037_s30 }
  0x2f   :  { %p4044_p4 = por %p4043_p3, %p4042_p2 }
  0x30   :  { %79 = vadd.xlane.f32.xlu0 %v78_v10 }
  0x31   :  { %76 = vadd.xlane.f32.xlu1 %v75_v11  ;;  %p4045_p5 = pnand %p4044_p4, %p4038_p1 }
  0xb5   :  { %v74_v12 = vpop.xlane.xlu0 %73 }
  0xb6   :  { %v71_v13 = vpop.xlane.xlu1 %70  ;;  %3889 = vrsqrt.f32 %v74_v12 }
  0xb7   :  { %3891 = vrsqrt.f32 %v71_v13 }
  0xb9   :  { %v80_v14 = vpop.xlane.xlu0 %79 }
  0xba   :  { %v77_v15 = vpop.xlane.xlu1 %76  ;;  %3893 = vrsqrt.f32 %v80_v14 }
  0xbb   :  { %3895 = vrsqrt.f32 %v77_v15 }
  0xbc   :  { %3897 = vtanh.f32 %v255_v26 }
  0xbd   :  { %3899 = vtanh.f32 %v256_v28 }
  0xc3   :  { %v3890_v16 = vpop.eup %3889 }
  0xc4   :  { %v3892_v17 = vpop.eup %3891  ;;  %v86_v18 = vmul.f32 %v3890_v16, %v57_v0 }
  0xc5   :  { %v85_v19 = vmul.f32 %v3892_v17, %v56_v2 }
  0xc6   :  { %3585 = vmatprep.subr.msk.mxu0 %vm68_vm0, %v86_v18 }
  0xc7   :  { %v3894_v20 = vpop.eup %3893  ;;  %3586 = vmatpush3.xpose.msk.msra.mxu0 %vm68_vm0, %v86_v18  ;;  %3589 = vmatprep.mubr.msk.f32.mxu0 %vm68_vm0, %v85_v19 }
  0xc8   :  { %v3896_v21 = vpop.eup %3895  ;;  %3587 = vmatprep.subr.msk.mxu0 %vm68_vm0, %v85_v19  ;;  %v88_v22 = vmul.f32 %v3894_v20, %v59_v1 }
  0xc9   :  { %v87_v23 = vmul.f32 %v3896_v21, %v58_v6  ;;  %v3898_v38 = vpop.eup %3897 }
  0xca   :  { %3592 = vmatprep.subr.msk.mxu1 %vm68_vm0, %v88_v22  ;;  %v3900_v40 = vpop.eup %3899 }
  0xcb   :  { %3588 = vmatpush3.xpose.msk.msra.mxu0 %vm68_vm0, %v85_v19  ;;  %3593 = vmatpush3.xpose.msk.msra.mxu1 %vm68_vm0, %v88_v22 }
  0xcc   :  { %3594 = vmatprep.subr.msk.mxu1 %vm68_vm0, %v87_v23  ;;  %3596 = vmatprep.mubr.msk.f32.mxu1 %vm68_vm0, %v87_v23 }
  0xcd   :  { %3599 = vmatprep.subr.mxu0 %v4070_v24 }
  0xce   :  { %3590 = vmatmul.mubr.msk.f32.vlgmr.msra.gmra.mxu0 %vm68_vm0, %v86_v18 }
  0xcf   :  { %3595 = vmatpush3.xpose.msk.msra.mxu1 %vm68_vm0, %v87_v23  ;;  %3603 = vmatprep.mubr.msk.f32.mxu0 %vm4071_vm1, %v4070_v24 }
  0xd0   :  { %3606 = vmatprep.subr.mxu1 %v4070_v24 }
  0xd2   :  { %3597 = vmatmul.mubr.msk.f32.vlgmr.msra.gmra.mxu1 %vm68_vm0, %v88_v22 }
  0xd3   :  { %3610 = vmatprep.mubr.msk.f32.mxu1 %vm4071_vm1, %v4070_v24 }
 0x18e   :  { %v3591_v30 = vpop.f32.mrf.mxu0 }
 0x18f   :  { %v4133_v31 = vmul.f32 %v3591_v30, %v63_v29 }
 0x190   :  { %v161_v33 = vpop.f32.mrf.mxu0 }
 0x191   :  { %3600 = vmatpush3.xpose.msk.msra.mxu0 %vm259_vm2, %v4133_v31  ;;  %v4138_v35 = vmul.f32 %v161_v33, %v62_v32 }
 0x192   :  { %v3598_v34 = vpop.f32.mrf.mxu1  ;;  %3601 = vmatprep.subr.mxu0 %v4070_v24 }
 0x193   :  { %v4140_v36 = vmul.f32 %v3598_v34, %v63_v29 }
 0x194   :  { %v242_v37 = vpop.f32.mrf.mxu1 }
 0x195   :  { %3602 = vmatpush3.xpose.msk.msra.mxu0 %vm259_vm2, %v4138_v35  ;;  %3607 = vmatpush3.xpose.msk.msra.mxu1 %vm259_vm2, %v4140_v36  ;;  %v4148_v39 = vmul.f32 %v242_v37, %v62_v32 }
 0x196   :  { %3608 = vmatprep.subr.mxu1 %v4070_v24  ;;  %3613 = vmatprep.subr.mxu0 %v4070_v24 }
 0x198   :  { %3604 = vmatmul.mubr.msk.f32.vlgmr.msra.gmra.mxu0 %vm259_vm2, %v3898_v38 }
 0x199   :  { %3609 = vmatpush3.xpose.msk.msra.mxu1 %vm259_vm2, %v4148_v39  ;;  %3614 = vmatpush3.xpose.msk.msra.mxu0 %vm259_vm2, %v4133_v31 }
 0x19a   :  { %3615 = vmatprep.subr.mxu0 %v4070_v24  ;;  %3620 = vmatprep.subr.mxu1 %v4070_v24 }
 0x19b   :  { %3617 = vmatprep.mubr.msk.f32.mxu0 %vm4071_vm1, %v4070_v24 }
 0x19c   :  { %3611 = vmatmul.mubr.msk.f32.vlgmr.msra.gmra.mxu1 %vm259_vm2, %v3900_v40 }
 0x19d   :  { %3616 = vmatpush3.xpose.msk.msra.mxu0 %vm259_vm2, %v4138_v35  ;;  %3621 = vmatpush3.xpose.msk.msra.mxu1 %vm259_vm2, %v4140_v36 }
 0x19e   :  { %3622 = vmatprep.subr.mxu1 %v4070_v24  ;;  %3627 = vmatprep.subr.mxu0 %v4070_v24 }
 0x19f   :  { %3624 = vmatprep.mubr.msk.f32.mxu1 %vm4071_vm1, %v4070_v24 }
 0x1a1   :  { %3623 = vmatpush3.xpose.msk.msra.mxu1 %vm259_vm2, %v4148_v39 }
 0x1a2   :  { %3634 = vmatprep.subr.mxu1 %v4070_v24 }
 0x258   :  { %v335_v41 = vpop.f32.mrf.mxu0 }
 0x259   :  { %v418_v42 = vadd.f32 %v335_v41, %v4127_v25 }
 0x25a   :  { %v3605_v43 = vpop.f32.mrf.mxu0 }
 0x25b   :  { %v420_v44 = vmul.f32 0.5, %v418_v42 }
 0x25c   :  { %v414_v45 = vpop.f32.mrf.mxu1 }
 0x25d   :  { %3901 = vtanh.f32 %v420_v44  ;;  %v419_v46 = vadd.f32 %v414_v45, %v4130_v27 }
 0x25e   :  { %v3612_v47 = vpop.f32.mrf.mxu1 }
 0x25f   :  { %v421_v48 = vmul.f32 0.5, %v419_v46 }
 0x261   :  { %3903 = vtanh.f32 %v421_v48 }
 0x26a   :  { %v3902_v49 = vpop.eup %3901 }
 0x26b   :  { %3618 = vmatmul.mubr.msk.f32.vlgmr.msra.gmra.mxu0 %vm259_vm2, %v3902_v49 }
 0x26c   :  { %3628 = vmatpush3.xpose.msk.msra.mxu0 %vm259_vm2, %v4133_v31  ;;  %3631 = vmatprep.mubr.msk.f32.mxu0 %vm4071_vm1, %v4070_v24 }
 0x26d   :  { %3629 = vmatprep.subr.mxu0 %v4070_v24 }
 0x26e   :  { %v3904_v50 = vpop.eup %3903 }
 0x26f   :  { %3625 = vmatmul.mubr.msk.f32.vlgmr.msra.gmra.mxu1 %vm259_vm2, %v3904_v50 }
 0x270   :  { %3630 = vmatpush3.xpose.msk.msra.mxu0 %vm259_vm2, %v4138_v35  ;;  %3635 = vmatpush3.xpose.msk.msra.mxu1 %vm259_vm2, %v4140_v36 }
 0x271   :  { %3636 = vmatprep.subr.mxu1 %v4070_v24  ;;  %3641 = vmatprep.subr.mxu0 %v4070_v24 }
 0x272   :  { %3638 = vmatprep.mubr.msk.f32.mxu1 %vm4071_vm1, %v4070_v24 }
 0x274   :  { %3637 = vmatpush3.xpose.msk.msra.mxu1 %vm259_vm2, %v4148_v39 }
 0x275   :  { %3648 = vmatprep.subr.mxu1 %v4070_v24 }
 0x32b   :  { %v493_v51 = vpop.f32.mrf.mxu0 }
 0x32c   :  { %v570_v52 = vadd.f32 %v493_v51, %v4127_v25 }
 0x32d   :  { %v3619_v53 = vpop.f32.mrf.mxu0 }
 0x32e   :  { %v572_v54 = vmul.f32 0.5, %v570_v52 }
 0x32f   :  { %v566_v55 = vpop.f32.mrf.mxu1 }
 0x330   :  { %3905 = vtanh.f32 %v572_v54  ;;  %v571_v56 = vadd.f32 %v566_v55, %v4130_v27 }
 0x331   :  { %v3626_v57 = vpop.f32.mrf.mxu1 }
 0x332   :  { %v573_v58 = vmul.f32 0.5, %v571_v56 }
 0x334   :  { %3907 = vtanh.f32 %v573_v58 }
 0x33d   :  { %v3906_v59 = vpop.eup %3905 }
 0x33e   :  { %3632 = vmatmul.mubr.msk.f32.vlgmr.msra.gmra.mxu0 %vm259_vm2, %v3906_v59 }
 0x33f   :  { %3642 = vmatpush3.xpose.msk.msra.mxu0 %vm259_vm2, %v4133_v31  ;;  %3645 = vmatprep.mubr.msk.f32.mxu0 %vm4071_vm1, %v4070_v24 }
 0x340   :  { %3643 = vmatprep.subr.mxu0 %v4070_v24 }
 0x341   :  { %v3908_v60 = vpop.eup %3907 }
 0x342   :  { %3639 = vmatmul.mubr.msk.f32.vlgmr.msra.gmra.mxu1 %vm259_vm2, %v3908_v60 }
 0x343   :  { %3644 = vmatpush3.xpose.msk.msra.mxu0 %vm259_vm2, %v4138_v35  ;;  %3649 = vmatpush3.xpose.msk.msra.mxu1 %vm259_vm2, %v4140_v36 }
 0x344   :  { %3650 = vmatprep.subr.mxu1 %v4070_v24  ;;  %3655 = vmatprep.subr.mxu0 %v4070_v24 }
 0x345   :  { %3652 = vmatprep.mubr.msk.f32.mxu1 %vm4071_vm1, %v4070_v24 }
 0x347   :  { %3651 = vmatpush3.xpose.msk.msra.mxu1 %vm259_vm2, %v4148_v39 }
 0x348   :  { %3662 = vmatprep.subr.mxu1 %v4070_v24 }
 0x3fe   :  { %v645_v61 = vpop.f32.mrf.mxu0 }
 0x3ff   :  { %v722_v62 = vadd.f32 %v645_v61, %v4127_v25 }
 0x400   :  { %v3633_v63 = vpop.f32.mrf.mxu0 }
 0x401   :  { %v724_v0 = vmul.f32 0.5, %v722_v62 }
 0x402   :  { %v718_v1 = vpop.f32.mrf.mxu1 }
 0x403   :  { %3909 = vtanh.f32 %v724_v0  ;;  %v723_v2 = vadd.f32 %v718_v1, %v4130_v27 }
 0x404   :  { %v3640_v3 = vpop.f32.mrf.mxu1 }
 0x405   :  { %v725_v4 = vmul.f32 0.5, %v723_v2 }
 0x407   :  { %3911 = vtanh.f32 %v725_v4 }
 0x410   :  { %v3910_v5 = vpop.eup %3909 }
 0x411   :  { %3646 = vmatmul.mubr.msk.f32.vlgmr.msra.gmra.mxu0 %vm259_vm2, %v3910_v5 }
 0x412   :  { %3656 = vmatpush3.xpose.msk.msra.mxu0 %vm259_vm2, %v4133_v31  ;;  %3659 = vmatprep.mubr.msk.f32.mxu0 %vm4071_vm1, %v4070_v24 }
 0x413   :  { %3657 = vmatprep.subr.mxu0 %v4070_v24 }
 0x414   :  { %v3912_v6 = vpop.eup %3911 }
 0x415   :  { %3653 = vmatmul.mubr.msk.f32.vlgmr.msra.gmra.mxu1 %vm259_vm2, %v3912_v6 }
 0x416   :  { %3658 = vmatpush3.xpose.msk.msra.mxu0 %vm259_vm2, %v4138_v35  ;;  %3663 = vmatpush3.xpose.msk.msra.mxu1 %vm259_vm2, %v4140_v36 }
 0x417   :  { %3664 = vmatprep.subr.mxu1 %v4070_v24  ;;  %3669 = vmatprep.subr.mxu0 %v4070_v24 }
 0x418   :  { %3666 = vmatprep.mubr.msk.f32.mxu1 %vm4071_vm1, %v4070_v24 }
 0x41a   :  { %3665 = vmatpush3.xpose.msk.msra.mxu1 %vm259_vm2, %v4148_v39 }
 0x41b   :  { %3676 = vmatprep.subr.mxu1 %v4070_v24 }
 0x4d1   :  { %v797_v7 = vpop.f32.mrf.mxu0 }
 0x4d2   :  { %v874_v8 = vadd.f32 %v797_v7, %v4127_v25 }
 0x4d3   :  { %v3647_v9 = vpop.f32.mrf.mxu0 }
 0x4d4   :  { %v876_v10 = vmul.f32 0.5, %v874_v8 }
 0x4d5   :  { %v870_v11 = vpop.f32.mrf.mxu1 }
 0x4d6   :  { %3913 = vtanh.f32 %v876_v10  ;;  %v875_v12 = vadd.f32 %v870_v11, %v4130_v27 }
 0x4d7   :  { %v3654_v13 = vpop.f32.mrf.mxu1 }
 0x4d8   :  { %v877_v14 = vmul.f32 0.5, %v875_v12 }
 0x4da   :  { %3915 = vtanh.f32 %v877_v14 }
 0x4e3   :  { %v3914_v15 = vpop.eup %3913 }
 0x4e4   :  { %3660 = vmatmul.mubr.msk.f32.vlgmr.msra.gmra.mxu0 %vm259_vm2, %v3914_v15 }
 0x4e5   :  { %3670 = vmatpush3.xpose.msk.msra.mxu0 %vm259_vm2, %v4133_v31  ;;  %3673 = vmatprep.mubr.msk.f32.mxu0 %vm4071_vm1, %v4070_v24 }
 0x4e6   :  { %3671 = vmatprep.subr.mxu0 %v4070_v24 }
 0x4e7   :  { %v3916_v16 = vpop.eup %3915 }
 0x4e8   :  { %3667 = vmatmul.mubr.msk.f32.vlgmr.msra.gmra.mxu1 %vm259_vm2, %v3916_v16 }
 0x4e9   :  { %3672 = vmatpush3.xpose.msk.msra.mxu0 %vm259_vm2, %v4138_v35  ;;  %3677 = vmatpush3.xpose.msk.msra.mxu1 %vm259_vm2, %v4140_v36 }
 0x4ea   :  { %3678 = vmatprep.subr.mxu1 %v4070_v24  ;;  %3683 = vmatprep.subr.mxu0 %v4070_v24 }
 0x4eb   :  { %3680 = vmatprep.mubr.msk.f32.mxu1 %vm4071_vm1, %v4070_v24 }
 0x4ed   :  { %3679 = vmatpush3.xpose.msk.msra.mxu1 %vm259_vm2, %v4148_v39 }
 0x4ee   :  { %3690 = vmatprep.subr.mxu1 %v4070_v24 }
 0x5a4   :  { %v949_v17 = vpop.f32.mrf.mxu0 }
 0x5a5   :  { %v1026_v18 = vadd.f32 %v949_v17, %v4127_v25 }
 0x5a6   :  { %v3661_v19 = vpop.f32.mrf.mxu0 }
 0x5a7   :  { %v1028_v20 = vmul.f32 0.5, %v1026_v18 }
 0x5a8   :  { %v1022_v21 = vpop.f32.mrf.mxu1 }
 0x5a9   :  { %3917 = vtanh.f32 %v1028_v20  ;;  %v1027_v22 = vadd.f32 %v1022_v21, %v4130_v27 }
 0x5aa   :  { %v3668_v23 = vpop.f32.mrf.mxu1 }
 0x5ab   :  { %v1029_v26 = vmul.f32 0.5, %v1027_v22 }
 0x5ad   :  { %3919 = vtanh.f32 %v1029_v26 }
 0x5b6   :  { %v3918_v28 = vpop.eup %3917 }
 0x5b7   :  { %3674 = vmatmul.mubr.msk.f32.vlgmr.msra.gmra.mxu0 %vm259_vm2, %v3918_v28 }
 0x5b8   :  { %3684 = vmatpush3.xpose.msk.msra.mxu0 %vm259_vm2, %v4133_v31  ;;  %3687 = vmatprep.mubr.msk.f32.mxu0 %vm4071_vm1, %v4070_v24 }
 0x5b9   :  { %3685 = vmatprep.subr.mxu0 %v4070_v24 }
 0x5ba   :  { %v3920_v29 = vpop.eup %3919 }
 0x5bb   :  { %3681 = vmatmul.mubr.msk.f32.vlgmr.msra.gmra.mxu1 %vm259_vm2, %v3920_v29 }
 0x5bc   :  { %3686 = vmatpush3.xpose.msk.msra.mxu0 %vm259_vm2, %v4138_v35  ;;  %3691 = vmatpush3.xpose.msk.msra.mxu1 %vm259_vm2, %v4140_v36 }
 0x5bd   :  { %3692 = vmatprep.subr.mxu1 %v4070_v24  ;;  %3697 = vmatprep.subr.mxu0 %v4070_v24 }
 0x5be   :  { %3694 = vmatprep.mubr.msk.f32.mxu1 %vm4071_vm1, %v4070_v24 }
 0x5c0   :  { %3693 = vmatpush3.xpose.msk.msra.mxu1 %vm259_vm2, %v4148_v39 }
 0x5c1   :  { %3704 = vmatprep.subr.mxu1 %v4070_v24 }
 0x677   :  { %v1101_v30 = vpop.f32.mrf.mxu0 }
 0x678   :  { %v1178_v32 = vadd.f32 %v1101_v30, %v4127_v25 }
 0x679   :  { %v3675_v33 = vpop.f32.mrf.mxu0 }
 0x67a   :  { %v1180_v34 = vmul.f32 0.5, %v1178_v32 }
 0x67b   :  { %v1174_v37 = vpop.f32.mrf.mxu1 }
 0x67c   :  { %3921 = vtanh.f32 %v1180_v34  ;;  %v1179_v38 = vadd.f32 %v1174_v37, %v4130_v27 }
 0x67d   :  { %v3682_v40 = vpop.f32.mrf.mxu1 }
 0x67e   :  { %v1181_v41 = vmul.f32 0.5, %v1179_v38 }
 0x680   :  { %3923 = vtanh.f32 %v1181_v41 }
 0x689   :  { %v3922_v42 = vpop.eup %3921 }
 0x68a   :  { %3688 = vmatmul.mubr.msk.f32.vlgmr.msra.gmra.mxu0 %vm259_vm2, %v3922_v42 }
 0x68b   :  { %3698 = vmatpush3.xpose.msk.msra.mxu0 %vm259_vm2, %v4133_v31  ;;  %3701 = vmatprep.mubr.msk.f32.mxu0 %vm4071_vm1, %v4070_v24 }
 0x68c   :  { %3699 = vmatprep.subr.mxu0 %v4070_v24 }
 0x68d   :  { %v3924_v43 = vpop.eup %3923 }
 0x68e   :  { %3695 = vmatmul.mubr.msk.f32.vlgmr.msra.gmra.mxu1 %vm259_vm2, %v3924_v43 }
 0x68f   :  { %3700 = vmatpush3.xpose.msk.msra.mxu0 %vm259_vm2, %v4138_v35  ;;  %3705 = vmatpush3.xpose.msk.msra.mxu1 %vm259_vm2, %v4140_v36 }
 0x690   :  { %3706 = vmatprep.subr.mxu1 %v4070_v24  ;;  %3711 = vmatprep.subr.mxu0 %v4070_v24 }
 0x691   :  { %3708 = vmatprep.mubr.msk.f32.mxu1 %vm4071_vm1, %v4070_v24 }
 0x693   :  { %3707 = vmatpush3.xpose.msk.msra.mxu1 %vm259_vm2, %v4148_v39 }
 0x694   :  { %3718 = vmatprep.subr.mxu1 %v4070_v24 }
 0x74a   :  { %v1253_v44 = vpop.f32.mrf.mxu0 }
 0x74b   :  { %v1330_v45 = vadd.f32 %v1253_v44, %v4127_v25 }
 0x74c   :  { %v3689_v46 = vpop.f32.mrf.mxu0 }
 0x74d   :  { %v1332_v47 = vmul.f32 0.5, %v1330_v45 }
 0x74e   :  { %v1326_v48 = vpop.f32.mrf.mxu1 }
 0x74f   :  { %3925 = vtanh.f32 %v1332_v47  ;;  %v1331_v49 = vadd.f32 %v1326_v48, %v4130_v27 }
 0x750   :  { %v3696_v50 = vpop.f32.mrf.mxu1 }
 0x751   :  { %v1333_v51 = vmul.f32 0.5, %v1331_v49 }
 0x753   :  { %3927 = vtanh.f32 %v1333_v51 }
 0x75c   :  { %v3926_v52 = vpop.eup %3925 }
 0x75d   :  { %3702 = vmatmul.mubr.msk.f32.vlgmr.msra.gmra.mxu0 %vm259_vm2, %v3926_v52 }
 0x75e   :  { %3712 = vmatpush3.xpose.msk.msra.mxu0 %vm259_vm2, %v4133_v31  ;;  %3715 = vmatprep.mubr.msk.f32.mxu0 %vm4071_vm1, %v4070_v24 }
 0x75f   :  { %3713 = vmatprep.subr.mxu0 %v4070_v24 }
 0x760   :  { %v3928_v53 = vpop.eup %3927 }
 0x761   :  { %3709 = vmatmul.mubr.msk.f32.vlgmr.msra.gmra.mxu1 %vm259_vm2, %v3928_v53 }
 0x762   :  { %3714 = vmatpush3.xpose.msk.msra.mxu0 %vm259_vm2, %v4138_v35  ;;  %3719 = vmatpush3.xpose.msk.msra.mxu1 %vm259_vm2, %v4140_v36 }
 0x763   :  { %3720 = vmatprep.subr.mxu1 %v4070_v24  ;;  %3725 = vmatprep.subr.mxu0 %v4070_v24 }
 0x764   :  { %3722 = vmatprep.mubr.msk.f32.mxu1 %vm4071_vm1, %v4070_v24 }
 0x766   :  { %3721 = vmatpush3.xpose.msk.msra.mxu1 %vm259_vm2, %v4148_v39 }
 0x767   :  { %3732 = vmatprep.subr.mxu1 %v4070_v24 }
 0x81d   :  { %v1405_v54 = vpop.f32.mrf.mxu0 }
 0x81e   :  { %v1482_v55 = vadd.f32 %v1405_v54, %v4127_v25 }
 0x81f   :  { %v3703_v56 = vpop.f32.mrf.mxu0 }
 0x820   :  { %v1484_v57 = vmul.f32 0.5, %v1482_v55 }
 0x821   :  { %v1478_v58 = vpop.f32.mrf.mxu1 }
 0x822   :  { %3929 = vtanh.f32 %v1484_v57  ;;  %v1483_v59 = vadd.f32 %v1478_v58, %v4130_v27 }
 0x823   :  { %v3710_v60 = vpop.f32.mrf.mxu1 }
 0x824   :  { %v1485_v61 = vmul.f32 0.5, %v1483_v59 }
 0x826   :  { %3931 = vtanh.f32 %v1485_v61 }
 0x82f   :  { %v3930_v62 = vpop.eup %3929 }
 0x830   :  { %3716 = vmatmul.mubr.msk.f32.vlgmr.msra.gmra.mxu0 %vm259_vm2, %v3930_v62 }
 0x831   :  { %3726 = vmatpush3.xpose.msk.msra.mxu0 %vm259_vm2, %v4133_v31  ;;  %3729 = vmatprep.mubr.msk.f32.mxu0 %vm4071_vm1, %v4070_v24 }
 0x832   :  { %3727 = vmatprep.subr.mxu0 %v4070_v24 }
 0x833   :  { %v3932_v63 = vpop.eup %3931 }
 0x834   :  { %3723 = vmatmul.mubr.msk.f32.vlgmr.msra.gmra.mxu1 %vm259_vm2, %v3932_v63 }
 0x835   :  { %3728 = vmatpush3.xpose.msk.msra.mxu0 %vm259_vm2, %v4138_v35  ;;  %3733 = vmatpush3.xpose.msk.msra.mxu1 %vm259_vm2, %v4140_v36 }
 0x836   :  { %3734 = vmatprep.subr.mxu1 %v4070_v24  ;;  %3739 = vmatprep.subr.mxu0 %v4070_v24 }
 0x837   :  { %3736 = vmatprep.mubr.msk.f32.mxu1 %vm4071_vm1, %v4070_v24 }
 0x839   :  { %3735 = vmatpush3.xpose.msk.msra.mxu1 %vm259_vm2, %v4148_v39 }
 0x83a   :  { %3746 = vmatprep.subr.mxu1 %v4070_v24 }
 0x8f0   :  { %v1557_v0 = vpop.f32.mrf.mxu0 }
 0x8f1   :  { %v1634_v1 = vadd.f32 %v1557_v0, %v4127_v25 }
 0x8f2   :  { %v3717_v2 = vpop.f32.mrf.mxu0 }
 0x8f3   :  { %v1636_v3 = vmul.f32 0.5, %v1634_v1 }
 0x8f4   :  { %v1630_v4 = vpop.f32.mrf.mxu1 }
 0x8f5   :  { %3933 = vtanh.f32 %v1636_v3  ;;  %v1635_v5 = vadd.f32 %v1630_v4, %v4130_v27 }
 0x8f6   :  { %v3724_v6 = vpop.f32.mrf.mxu1 }
 0x8f7   :  { %v1637_v7 = vmul.f32 0.5, %v1635_v5 }
 0x8f9   :  { %3935 = vtanh.f32 %v1637_v7 }
 0x902   :  { %v3934_v8 = vpop.eup %3933 }
 0x903   :  { %3730 = vmatmul.mubr.msk.f32.vlgmr.msra.gmra.mxu0 %vm259_vm2, %v3934_v8 }
 0x904   :  { %3740 = vmatpush3.xpose.msk.msra.mxu0 %vm259_vm2, %v4133_v31  ;;  %3743 = vmatprep.mubr.msk.f32.mxu0 %vm4071_vm1, %v4070_v24 }
 0x905   :  { %3741 = vmatprep.subr.mxu0 %v4070_v24 }
 0x906   :  { %v3936_v9 = vpop.eup %3935 }
 0x907   :  { %3737 = vmatmul.mubr.msk.f32.vlgmr.msra.gmra.mxu1 %vm259_vm2, %v3936_v9 }
 0x908   :  { %3742 = vmatpush3.xpose.msk.msra.mxu0 %vm259_vm2, %v4138_v35  ;;  %3747 = vmatpush3.xpose.msk.msra.mxu1 %vm259_vm2, %v4140_v36 }
 0x909   :  { %3748 = vmatprep.subr.mxu1 %v4070_v24  ;;  %3753 = vmatprep.subr.mxu0 %v4070_v24 }
 0x90a   :  { %3750 = vmatprep.mubr.msk.f32.mxu1 %vm4071_vm1, %v4070_v24 }
 0x90c   :  { %3749 = vmatpush3.xpose.msk.msra.mxu1 %vm259_vm2, %v4148_v39 }
 0x90d   :  { %3760 = vmatprep.subr.mxu1 %v4070_v24 }
 0x9c3   :  { %v1709_v10 = vpop.f32.mrf.mxu0 }
 0x9c4   :  { %v1786_v11 = vadd.f32 %v1709_v10, %v4127_v25 }
 0x9c5   :  { %v3731_v12 = vpop.f32.mrf.mxu0 }
 0x9c6   :  { %v1788_v13 = vmul.f32 0.5, %v1786_v11 }
 0x9c7   :  { %v1782_v14 = vpop.f32.mrf.mxu1 }
 0x9c8   :  { %3937 = vtanh.f32 %v1788_v13  ;;  %v1787_v15 = vadd.f32 %v1782_v14, %v4130_v27 }
 0x9c9   :  { %v3738_v16 = vpop.f32.mrf.mxu1 }
 0x9ca   :  { %v1789_v17 = vmul.f32 0.5, %v1787_v15 }
 0x9cc   :  { %3939 = vtanh.f32 %v1789_v17 }
 0x9d5   :  { %v3938_v18 = vpop.eup %3937 }
 0x9d6   :  { %3744 = vmatmul.mubr.msk.f32.vlgmr.msra.gmra.mxu0 %vm259_vm2, %v3938_v18 }
 0x9d7   :  { %3754 = vmatpush3.xpose.msk.msra.mxu0 %vm259_vm2, %v4133_v31  ;;  %3757 = vmatprep.mubr.msk.f32.mxu0 %vm4071_vm1, %v4070_v24 }
 0x9d8   :  { %3755 = vmatprep.subr.mxu0 %v4070_v24 }
 0x9d9   :  { %v3940_v19 = vpop.eup %3939 }
 0x9da   :  { %3751 = vmatmul.mubr.msk.f32.vlgmr.msra.gmra.mxu1 %vm259_vm2, %v3940_v19 }
 0x9db   :  { %3756 = vmatpush3.xpose.msk.msra.mxu0 %vm259_vm2, %v4138_v35  ;;  %3761 = vmatpush3.xpose.msk.msra.mxu1 %vm259_vm2, %v4140_v36 }
 0x9dc   :  { %3762 = vmatprep.subr.mxu1 %v4070_v24  ;;  %3767 = vmatprep.subr.mxu0 %v4070_v24 }
 0x9dd   :  { %3764 = vmatprep.mubr.msk.f32.mxu1 %vm4071_vm1, %v4070_v24 }
 0x9df   :  { %3763 = vmatpush3.xpose.msk.msra.mxu1 %vm259_vm2, %v4148_v39 }
 0x9e0   :  { %3774 = vmatprep.subr.mxu1 %v4070_v24 }
 0xa96   :  { %v1861_v20 = vpop.f32.mrf.mxu0 }
 0xa97   :  { %v1938_v21 = vadd.f32 %v1861_v20, %v4127_v25 }
 0xa98   :  { %v3745_v22 = vpop.f32.mrf.mxu0 }
 0xa99   :  { %v1940_v23 = vmul.f32 0.5, %v1938_v21 }
 0xa9a   :  { %v1934_v26 = vpop.f32.mrf.mxu1 }
 0xa9b   :  { %3941 = vtanh.f32 %v1940_v23  ;;  %v1939_v28 = vadd.f32 %v1934_v26, %v4130_v27 }
 0xa9c   :  { %v3752_v29 = vpop.f32.mrf.mxu1 }
 0xa9d   :  { %v1941_v30 = vmul.f32 0.5, %v1939_v28 }
 0xa9f   :  { %3943 = vtanh.f32 %v1941_v30 }
 0xaa8   :  { %v3942_v32 = vpop.eup %3941 }
 0xaa9   :  { %3758 = vmatmul.mubr.msk.f32.vlgmr.msra.gmra.mxu0 %vm259_vm2, %v3942_v32 }
 0xaaa   :  { %3768 = vmatpush3.xpose.msk.msra.mxu0 %vm259_vm2, %v4133_v31  ;;  %3771 = vmatprep.mubr.msk.f32.mxu0 %vm4071_vm1, %v4070_v24 }
 0xaab   :  { %3769 = vmatprep.subr.mxu0 %v4070_v24 }
 0xaac   :  { %v3944_v33 = vpop.eup %3943 }
 0xaad   :  { %3765 = vmatmul.mubr.msk.f32.vlgmr.msra.gmra.mxu1 %vm259_vm2, %v3944_v33 }
 0xaae   :  { %3770 = vmatpush3.xpose.msk.msra.mxu0 %vm259_vm2, %v4138_v35  ;;  %3775 = vmatpush3.xpose.msk.msra.mxu1 %vm259_vm2, %v4140_v36 }
 0xaaf   :  { %3776 = vmatprep.subr.mxu1 %v4070_v24  ;;  %3781 = vmatprep.subr.mxu0 %v4070_v24 }
 0xab0   :  { %3778 = vmatprep.mubr.msk.f32.mxu1 %vm4071_vm1, %v4070_v24 }
 0xab2   :  { %3777 = vmatpush3.xpose.msk.msra.mxu1 %vm259_vm2, %v4148_v39 }
 0xab3   :  { %3788 = vmatprep.subr.mxu1 %v4070_v24 }
 0xb69   :  { %v2013_v34 = vpop.f32.mrf.mxu0 }
 0xb6a   :  { %v2090_v37 = vadd.f32 %v2013_v34, %v4127_v25 }
 0xb6b   :  { %v3759_v38 = vpop.f32.mrf.mxu0 }
 0xb6c   :  { %v2092_v40 = vmul.f32 0.5, %v2090_v37 }
 0xb6d   :  { %v2086_v41 = vpop.f32.mrf.mxu1 }
 0xb6e   :  { %3945 = vtanh.f32 %v2092_v40  ;;  %v2091_v42 = vadd.f32 %v2086_v41, %v4130_v27 }
 0xb6f   :  { %v3766_v43 = vpop.f32.mrf.mxu1 }
 0xb70   :  { %v2093_v44 = vmul.f32 0.5, %v2091_v42 }
 0xb72   :  { %3947 = vtanh.f32 %v2093_v44 }
 0xb7b   :  { %v3946_v45 = vpop.eup %3945 }
 0xb7c   :  { %3772 = vmatmul.mubr.msk.f32.vlgmr.msra.gmra.mxu0 %vm259_vm2, %v3946_v45 }
 0xb7d   :  { %3782 = vmatpush3.xpose.msk.msra.mxu0 %vm259_vm2, %v4133_v31  ;;  %3785 = vmatprep.mubr.msk.f32.mxu0 %vm4071_vm1, %v4070_v24 }
 0xb7e   :  { %3783 = vmatprep.subr.mxu0 %v4070_v24 }
 0xb7f   :  { %v3948_v46 = vpop.eup %3947 }
 0xb80   :  { %3779 = vmatmul.mubr.msk.f32.vlgmr.msra.gmra.mxu1 %vm259_vm2, %v3948_v46 }
 0xb81   :  { %3784 = vmatpush3.xpose.msk.msra.mxu0 %vm259_vm2, %v4138_v35  ;;  %3789 = vmatpush3.xpose.msk.msra.mxu1 %vm259_vm2, %v4140_v36 }
 0xb82   :  { %3790 = vmatprep.subr.mxu1 %v4070_v24  ;;  %3795 = vmatprep.subr.mxu0 %v4070_v24 }
 0xb83   :  { %3792 = vmatprep.mubr.msk.f32.mxu1 %vm4071_vm1, %v4070_v24 }
 0xb85   :  { %3791 = vmatpush3.xpose.msk.msra.mxu1 %vm259_vm2, %v4148_v39 }
 0xb86   :  { %3802 = vmatprep.subr.mxu1 %v4070_v24 }
 0xc3c   :  { %v2165_v47 = vpop.f32.mrf.mxu0 }
 0xc3d   :  { %v2242_v48 = vadd.f32 %v2165_v47, %v4127_v25 }
 0xc3e   :  { %v3773_v49 = vpop.f32.mrf.mxu0 }
 0xc3f   :  { %v2244_v50 = vmul.f32 0.5, %v2242_v48 }
 0xc40   :  { %v2238_v51 = vpop.f32.mrf.mxu1 }
 0xc41   :  { %3949 = vtanh.f32 %v2244_v50  ;;  %v2243_v52 = vadd.f32 %v2238_v51, %v4130_v27 }
 0xc42   :  { %v3780_v53 = vpop.f32.mrf.mxu1 }
 0xc43   :  { %v2245_v54 = vmul.f32 0.5, %v2243_v52 }
 0xc45   :  { %3951 = vtanh.f32 %v2245_v54 }
 0xc4e   :  { %v3950_v55 = vpop.eup %3949 }
 0xc4f   :  { %3786 = vmatmul.mubr.msk.f32.vlgmr.msra.gmra.mxu0 %vm259_vm2, %v3950_v55 }
 0xc50   :  { %3796 = vmatpush3.xpose.msk.msra.mxu0 %vm259_vm2, %v4133_v31  ;;  %3799 = vmatprep.mubr.msk.f32.mxu0 %vm4071_vm1, %v4070_v24 }
 0xc51   :  { %3797 = vmatprep.subr.mxu0 %v4070_v24 }
 0xc52   :  { %v3952_v56 = vpop.eup %3951 }
 0xc53   :  { %3793 = vmatmul.mubr.msk.f32.vlgmr.msra.gmra.mxu1 %vm259_vm2, %v3952_v56 }
 0xc54   :  { %3798 = vmatpush3.xpose.msk.msra.mxu0 %vm259_vm2, %v4138_v35  ;;  %3803 = vmatpush3.xpose.msk.msra.mxu1 %vm259_vm2, %v4140_v36 }
 0xc55   :  { %3804 = vmatprep.subr.mxu1 %v4070_v24  ;;  %3809 = vmatprep.subr.mxu0 %v4070_v24 }
 0xc56   :  { %3806 = vmatprep.mubr.msk.f32.mxu1 %vm4071_vm1, %v4070_v24 }
 0xc58   :  { %3805 = vmatpush3.xpose.msk.msra.mxu1 %vm259_vm2, %v4148_v39 }
 0xc59   :  { %3816 = vmatprep.subr.mxu1 %v4070_v24 }
 0xd0f   :  { %v2317_v57 = vpop.f32.mrf.mxu0 }
 0xd10   :  { %v2394_v58 = vadd.f32 %v2317_v57, %v4127_v25 }
 0xd11   :  { %v3787_v59 = vpop.f32.mrf.mxu0 }
 0xd12   :  { %v2396_v60 = vmul.f32 0.5, %v2394_v58 }
 0xd13   :  { %v2390_v61 = vpop.f32.mrf.mxu1 }
 0xd14   :  { %3953 = vtanh.f32 %v2396_v60  ;;  %v2395_v62 = vadd.f32 %v2390_v61, %v4130_v27 }
 0xd15   :  { %v3794_v63 = vpop.f32.mrf.mxu1 }
 0xd16   :  { %v2397_v0 = vmul.f32 0.5, %v2395_v62 }
 0xd18   :  { %3955 = vtanh.f32 %v2397_v0 }
 0xd21   :  { %v3954_v1 = vpop.eup %3953 }
 0xd22   :  { %3800 = vmatmul.mubr.msk.f32.vlgmr.msra.gmra.mxu0 %vm259_vm2, %v3954_v1 }
 0xd23   :  { %3810 = vmatpush3.xpose.msk.msra.mxu0 %vm259_vm2, %v4133_v31  ;;  %3813 = vmatprep.mubr.msk.f32.mxu0 %vm4071_vm1, %v4070_v24 }
 0xd24   :  { %3811 = vmatprep.subr.mxu0 %v4070_v24 }
 0xd25   :  { %v3956_v2 = vpop.eup %3955 }
 0xd26   :  { %3807 = vmatmul.mubr.msk.f32.vlgmr.msra.gmra.mxu1 %vm259_vm2, %v3956_v2 }
 0xd27   :  { %3812 = vmatpush3.xpose.msk.msra.mxu0 %vm259_vm2, %v4138_v35  ;;  %3817 = vmatpush3.xpose.msk.msra.mxu1 %vm259_vm2, %v4140_v36 }
 0xd28   :  { %3818 = vmatprep.subr.mxu1 %v4070_v24  ;;  %3823 = vmatprep.subr.mxu0 %v4070_v24 }
 0xd29   :  { %3820 = vmatprep.mubr.msk.f32.mxu1 %vm4071_vm1, %v4070_v24 }
 0xd2b   :  { %3819 = vmatpush3.xpose.msk.msra.mxu1 %vm259_vm2, %v4148_v39 }
 0xd2c   :  { %3830 = vmatprep.subr.mxu1 %v4070_v24 }
 0xde2   :  { %v2469_v3 = vpop.f32.mrf.mxu0 }
 0xde3   :  { %v2546_v4 = vadd.f32 %v2469_v3, %v4127_v25 }
 0xde4   :  { %v3801_v5 = vpop.f32.mrf.mxu0 }
 0xde5   :  { %v2548_v6 = vmul.f32 0.5, %v2546_v4 }
 0xde6   :  { %v2542_v7 = vpop.f32.mrf.mxu1 }
 0xde7   :  { %3957 = vtanh.f32 %v2548_v6  ;;  %v2547_v8 = vadd.f32 %v2542_v7, %v4130_v27 }
 0xde8   :  { %v3808_v9 = vpop.f32.mrf.mxu1 }
 0xde9   :  { %v2549_v10 = vmul.f32 0.5, %v2547_v8 }
 0xdeb   :  { %3959 = vtanh.f32 %v2549_v10 }
 0xdf4   :  { %v3958_v11 = vpop.eup %3957 }
 0xdf5   :  { %3814 = vmatmul.mubr.msk.f32.vlgmr.msra.gmra.mxu0 %vm259_vm2, %v3958_v11 }
 0xdf6   :  { %3824 = vmatpush3.xpose.msk.msra.mxu0 %vm259_vm2, %v4133_v31  ;;  %3827 = vmatprep.mubr.msk.f32.mxu0 %vm4071_vm1, %v4070_v24 }
 0xdf7   :  { %3825 = vmatprep.subr.mxu0 %v4070_v24 }
 0xdf8   :  { %v3960_v12 = vpop.eup %3959 }
 0xdf9   :  { %3821 = vmatmul.mubr.msk.f32.vlgmr.msra.gmra.mxu1 %vm259_vm2, %v3960_v12 }
 0xdfa   :  { %3826 = vmatpush3.xpose.msk.msra.mxu0 %vm259_vm2, %v4138_v35  ;;  %3831 = vmatpush3.xpose.msk.msra.mxu1 %vm259_vm2, %v4140_v36 }
 0xdfb   :  { %3832 = vmatprep.subr.mxu1 %v4070_v24  ;;  %3837 = vmatprep.subr.mxu0 %v4070_v24 }
 0xdfc   :  { %3834 = vmatprep.mubr.msk.f32.mxu1 %vm4071_vm1, %v4070_v24 }
 0xdfe   :  { %3833 = vmatpush3.xpose.msk.msra.mxu1 %vm259_vm2, %v4148_v39 }
 0xdff   :  { %3844 = vmatprep.subr.mxu1 %v4070_v24 }
 0xeb5   :  { %v2621_v13 = vpop.f32.mrf.mxu0 }
 0xeb6   :  { %v2698_v14 = vadd.f32 %v2621_v13, %v4127_v25 }
 0xeb7   :  { %v3815_v15 = vpop.f32.mrf.mxu0 }
 0xeb8   :  { %v2700_v16 = vmul.f32 0.5, %v2698_v14 }
 0xeb9   :  { %v2694_v17 = vpop.f32.mrf.mxu1 }
 0xeba   :  { %3961 = vtanh.f32 %v2700_v16  ;;  %v2699_v18 = vadd.f32 %v2694_v17, %v4130_v27 }
 0xebb   :  { %v3822_v19 = vpop.f32.mrf.mxu1 }
 0xebc   :  { %v2701_v20 = vmul.f32 0.5, %v2699_v18 }
 0xebe   :  { %3963 = vtanh.f32 %v2701_v20 }
 0xec7   :  { %v3962_v21 = vpop.eup %3961 }
 0xec8   :  { %3828 = vmatmul.mubr.msk.f32.vlgmr.msra.gmra.mxu0 %vm259_vm2, %v3962_v21 }
 0xec9   :  { %3838 = vmatpush3.xpose.msk.msra.mxu0 %vm259_vm2, %v4133_v31  ;;  %3841 = vmatprep.mubr.msk.f32.mxu0 %vm4071_vm1, %v4070_v24 }
 0xeca   :  { %3839 = vmatprep.subr.mxu0 %v4070_v24 }
 0xecb   :  { %v3964_v22 = vpop.eup %3963 }
 0xecc   :  { %3835 = vmatmul.mubr.msk.f32.vlgmr.msra.gmra.mxu1 %vm259_vm2, %v3964_v22 }
 0xecd   :  { %3840 = vmatpush3.xpose.msk.msra.mxu0 %vm259_vm2, %v4138_v35  ;;  %3845 = vmatpush3.xpose.msk.msra.mxu1 %vm259_vm2, %v4140_v36 }
 0xece   :  { %3846 = vmatprep.subr.mxu1 %v4070_v24  ;;  %3851 = vmatprep.subr.mxu0 %v4070_v24 }
 0xecf   :  { %3848 = vmatprep.mubr.msk.f32.mxu1 %vm4071_vm1, %v4070_v24 }
 0xed1   :  { %3847 = vmatpush3.xpose.msk.msra.mxu1 %vm259_vm2, %v4148_v39 }
 0xed2   :  { %3858 = vmatprep.subr.mxu1 %v4070_v24 }
 0xf88   :  { %v2773_v23 = vpop.f32.mrf.mxu0 }
 0xf89   :  { %v2850_v26 = vadd.f32 %v2773_v23, %v4127_v25 }
 0xf8a   :  { %v3829_v28 = vpop.f32.mrf.mxu0 }
 0xf8b   :  { %v2852_v29 = vmul.f32 0.5, %v2850_v26 }
 0xf8c   :  { %v2846_v30 = vpop.f32.mrf.mxu1 }
 0xf8d   :  { %3965 = vtanh.f32 %v2852_v29  ;;  %v2851_v32 = vadd.f32 %v2846_v30, %v4130_v27 }
 0xf8e   :  { %v3836_v33 = vpop.f32.mrf.mxu1 }
 0xf8f   :  { %v2853_v34 = vmul.f32 0.5, %v2851_v32 }
 0xf91   :  { %3967 = vtanh.f32 %v2853_v34 }
 0xf9a   :  { %v3966_v37 = vpop.eup %3965 }
 0xf9b   :  { %3842 = vmatmul.mubr.msk.f32.vlgmr.msra.gmra.mxu0 %vm259_vm2, %v3966_v37 }
 0xf9c   :  { %3852 = vmatpush3.xpose.msk.msra.mxu0 %vm259_vm2, %v4133_v31  ;;  %3855 = vmatprep.mubr.msk.f32.mxu0 %vm4071_vm1, %v4070_v24 }
 0xf9d   :  { %3853 = vmatprep.subr.mxu0 %v4070_v24 }
 0xf9e   :  { %v3968_v38 = vpop.eup %3967 }
 0xf9f   :  { %3849 = vmatmul.mubr.msk.f32.vlgmr.msra.gmra.mxu1 %vm259_vm2, %v3968_v38 }
 0xfa0   :  { %3854 = vmatpush3.xpose.msk.msra.mxu0 %vm259_vm2, %v4138_v35  ;;  %3859 = vmatpush3.xpose.msk.msra.mxu1 %vm259_vm2, %v4140_v36 }
 0xfa1   :  { %3860 = vmatprep.subr.mxu1 %v4070_v24  ;;  %3865 = vmatprep.subr.mxu0 %v4070_v24 }
 0xfa2   :  { %3862 = vmatprep.mubr.msk.f32.mxu1 %vm4071_vm1, %v4070_v24 }
 0xfa4   :  { %3861 = vmatpush3.xpose.msk.msra.mxu1 %vm259_vm2, %v4148_v39 }
 0xfa5   :  { %3872 = vmatprep.subr.mxu1 %v4070_v24 }
0x105b   :  { %v2925_v40 = vpop.f32.mrf.mxu0 }
0x105c   :  { %v3002_v41 = vadd.f32 %v2925_v40, %v4127_v25 }
0x105d   :  { %v3843_v42 = vpop.f32.mrf.mxu0 }
0x105e   :  { %v3004_v43 = vmul.f32 0.5, %v3002_v41 }
0x105f   :  { %v2998_v44 = vpop.f32.mrf.mxu1 }
0x1060   :  { %3969 = vtanh.f32 %v3004_v43  ;;  %v3003_v45 = vadd.f32 %v2998_v44, %v4130_v27 }
0x1061   :  { %v3850_v46 = vpop.f32.mrf.mxu1 }
0x1062   :  { %v3005_v47 = vmul.f32 0.5, %v3003_v45 }
0x1064   :  { %3971 = vtanh.f32 %v3005_v47 }
0x106d   :  { %v3970_v48 = vpop.eup %3969 }
0x106e   :  { %3856 = vmatmul.mubr.msk.f32.vlgmr.msra.gmra.mxu0 %vm259_vm2, %v3970_v48 }
0x106f   :  { %3866 = vmatpush3.xpose.msk.msra.mxu0 %vm259_vm2, %v4133_v31  ;;  %3869 = vmatprep.mubr.msk.f32.mxu0 %vm4071_vm1, %v4070_v24 }
0x1070   :  { %3867 = vmatprep.subr.mxu0 %v4070_v24 }
0x1071   :  { %v3972_v49 = vpop.eup %3971 }
0x1072   :  { %3863 = vmatmul.mubr.msk.f32.vlgmr.msra.gmra.mxu1 %vm259_vm2, %v3972_v49 }
0x1073   :  { %3868 = vmatpush3.xpose.msk.msra.mxu0 %vm259_vm2, %v4138_v35  ;;  %3873 = vmatpush3.xpose.msk.msra.mxu1 %vm259_vm2, %v4140_v36 }
0x1074   :  { %3874 = vmatprep.subr.mxu1 %v4070_v24  ;;  %3876 = vmatprep.mubr.msk.f32.mxu1 %vm4071_vm1, %v4070_v24 }
0x1077   :  { %3875 = vmatpush3.xpose.msk.msra.mxu1 %vm259_vm2, %v4148_v39 }
0x112e   :  { %v3077_v31 = vpop.f32.mrf.mxu0 }
0x112f   :  { %v3154_v50 = vadd.f32 %v3077_v31, %v4127_v25 }
0x1130   :  { %v3857_v51 = vpop.f32.mrf.mxu0 }
0x1131   :  { %v3156_v52 = vmul.f32 0.5, %v3154_v50 }
0x1132   :  { %v3150_v53 = vpop.f32.mrf.mxu1 }
0x1133   :  { %3973 = vtanh.f32 %v3156_v52  ;;  %v3155_v35 = vadd.f32 %v3150_v53, %v4130_v27 }
0x1134   :  { %v3864_v54 = vpop.f32.mrf.mxu1 }
0x1135   :  { %v3157_v55 = vmul.f32 0.5, %v3155_v35 }
0x1137   :  { %3975 = vtanh.f32 %v3157_v55 }
0x1140   :  { %v3974_v36 = vpop.eup %3973 }
0x1141   :  { %3870 = vmatmul.mubr.msk.f32.vlgmr.msra.gmra.mxu0 %vm259_vm2, %v3974_v36 }
0x1144   :  { %v3976_v56 = vpop.eup %3975 }
0x1145   :  { %3877 = vmatmul.mubr.msk.f32.vlgmr.msra.gmra.mxu1 %vm259_vm2, %v3976_v56 }
0x1201   :  { %v3229_v24 = vpop.f32.mrf.mxu0 }
0x1202   :  { %v3306_v39 = vadd.f32 %v3229_v24, %v4127_v25 }
0x1203   :  { %v3871_v57 = vpop.f32.mrf.mxu0 }
0x1204   :  { %3309 = vst.msk [vmem:[#allocation8] sm:$0x1] %vm3308_vm3, %v3306_v39 }
0x1205   :  { %v3302_v58 = vpop.f32.mrf.mxu1 }
0x1206   :  { %v3307_v59 = vadd.f32 %v3302_v58, %v4130_v27 }
0x1207   :  { %v3878_v60 = vpop.f32.mrf.mxu1 }
0x1208   :  { %3310 = vst.msk [vmem:[#allocation8 + $0x1] sm:$0x1] %vm3308_vm3, %v3307_v59 }
0x1209   :  { %4048 = shalt.err (!%p4045_p5)
}
0x120a   :  { %3322 = dma.vmem_to_hbm [thread:$0]  %s3317_s2, 32, %s4544_s3, [#allocation4], %s4064_s15, %s4064_s15, %s4065_s16  }
0x120b   :  { %4061 = dma.done.wait [#allocation4], 32  }
0x120c   :  { %4062 = vsyncadd [#allocation4], 4294967264 }
0x120d   :  { %3326 = vsyncpa [#allocation3], 1 }
0x120e   :  { %3327 = vsyncpa [#allocation6], 1 }
0x120f   :  { %3328 = vsyncpa [#allocation4], 1 }

</bundles_post_ra>
